<compile_context>
chip_gen: v7x
topology: tpu7x:2x2x1
jax: 0.10.0
libtpu: 0.0.40
codegen_flags: <defaults>
</compile_context>

<pallas_src>
import functools

import jax
import jax.numpy as jnp
from jax.experimental import pallas as pl
from jax.experimental.pallas import tpu as pltpu


def _round_up(n, m):
    return ((n + m - 1) // m) * m


def _pick_vmem_limit_bytes():
    """Generation-aware VMEM limit with headroom; safe fallback if query fails."""
    try:
        cap = int(pltpu.get_tpu_info().vmem_capacity_bytes)
        # ~12 MiB headroom for compiler-internal scratch / double-buffered x,
        # and never ask for more than 100 MiB even on 128 MiB parts.
        return max(32 << 20, min(100 << 20, cap - (12 << 20)))
    except Exception:
        return 64 << 20


def _default_num_batch_blocks():
    """1 on single-TensorCore chips (v5e/v6e); 2 on 2-TC parts (v7x)."""
    try:
        kind = jax.local_devices()[0].device_kind.lower()
        if "v7" in kind:
            return 2
    except Exception:
        pass
    return 1


def vanilla_rnn_kernel(x_ref, whx_ref, bh_ref, bp_ref, whh_hbm, wph_hbm,
                       y_ref, whh_vmem, wph_vmem, dma_sems, *, mxu_dtype):
    """One batch block of the full recurrence.

    x_ref   : (B_blk, T)  f32  batch-major input slice (input_dim == 1), VMEM
    whx_ref : (1, Hp)     f32  W_hx^T, zero-padded, VMEM
    bh_ref  : (1, Hp)     f32  b_h^T, zero-padded, VMEM
    bp_ref  : (1, Cp)     f32  b_p^T, zero-padded, VMEM
    whh_hbm : (Hp, Hp)    mxu_dtype  W_hh^T, zero-padded, HBM (ANY)
    wph_hbm : (Hp, Cp)    mxu_dtype  W_ph^T, zero-padded, HBM (ANY)
    y_ref   : (B_blk, Cp) f32  y at the last timestep (lane-dense), VMEM
    whh_vmem/wph_vmem : single-buffered VMEM staging for the weights
    dma_sems: (2,) DMA semaphores
    """
    _, T = x_ref.shape

    # Stage the grid-invariant weights once per block (single-buffered; the
    # default pipeline would double-buffer them for no benefit).
    whh_cp = pltpu.make_async_copy(whh_hbm, whh_vmem, dma_sems.at[0])
    wph_cp = pltpu.make_async_copy(wph_hbm, wph_vmem, dma_sems.at[1])
    whh_cp.start()
    wph_cp.start()

    whx = whx_ref[...]                               # (1, Hp) f32
    bh = bh_ref[...]                                 # (1, Hp) f32

    # t = 0: h_prev == 0, so the W_hh term vanishes exactly.
    h = jnp.tanh(x_ref[:, 0:1] * whx + bh)           # (B_blk, Hp) f32

    whh_cp.wait()

    # Fully unrolled recurrence (T is a small static constant in this module).
    # Per-step input contribution is computed in the body (bounded live range)
    # and is off the h-chain, so it overlaps with the MXU dot.
    # TODO(synk): for very long T, use lax.fori_loop over time chunks instead.
    for t in range(1, T):
        hh = jnp.dot(h.astype(mxu_dtype), whh_vmem[...],
                     preferred_element_type=jnp.float32)        # (B_blk, Hp)
        h = jnp.tanh(x_ref[:, t:t + 1] * whx + bh + hh)

    wph_cp.wait()
    y = jnp.dot(h.astype(mxu_dtype), wph_vmem[...],
                preferred_element_type=jnp.float32) + bp_ref[...]
    y_ref[...] = y.astype(y_ref.dtype)


def vanilla_rnn_forward(x, W_hx, W_hh, W_ph, b_h, b_p, *,
                        mxu_dtype=jnp.float32, num_batch_blocks=None):
    """x: (batch, seq_length) f32, same layout as the torch module input.

    Returns (num_classes, batch), matching the PyTorch forward.

    mxu_dtype: MXU operand dtype for the recurrent / output matmuls. f32
      operands are multi-pass on the MXU; bf16 operands (f32 accumulate, f32
      tanh) shorten the serial per-step chain at the cost of small drift.
    num_batch_blocks: batch split across the grid. Default: 1 on single-TC
      chips (v5e/v6e), 2 on 2-TC parts (v7x) so each core takes half the batch.
    """
    batch, seq_length = x.shape
    assert seq_length >= 1, "seq_length == 0 returns None in the torch module"
    num_hidden, input_dim = W_hx.shape
    assert input_dim == 1, "the torch forward implies input_dim == 1"
    num_classes = W_ph.shape[0]

    # --- pad to hardware-friendly tiles (lanes = 128, sublanes = 8) ---------
    Hp = _round_up(num_hidden, 128)
    Cp = _round_up(num_classes, 128)
    Bp = _round_up(batch, 8)

    if num_batch_blocks is None:
        num_batch_blocks = _default_num_batch_blocks()
    num_batch_blocks = max(1, int(num_batch_blocks))
    B_blk = _round_up(-(-Bp // num_batch_blocks), 8)     # ceil-div, multiple of 8
    Bp = _round_up(Bp, B_blk)
    num_blocks = Bp // B_blk

    f32 = jnp.float32
    x_pad = jnp.pad(x.astype(f32), ((0, Bp - batch), (0, 0)))                 # (Bp, T)
    whx_row = jnp.pad(W_hx.astype(f32).T, ((0, 0), (0, Hp - num_hidden)))     # (1, Hp)
    bh_row = jnp.pad(b_h.astype(f32).T, ((0, 0), (0, Hp - num_hidden)))       # (1, Hp)
    bp_row = jnp.pad(b_p.astype(f32).T, ((0, 0), (0, Cp - num_classes)))      # (1, Cp)
    # Pre-cast the large weights to the MXU operand dtype in the wrapper
    # (halves their DMA bytes and VMEM residency when mxu_dtype=bf16).
    whh_t = jnp.pad(W_hh.astype(f32).T,
                    ((0, Hp - num_hidden), (0, Hp - num_hidden))).astype(mxu_dtype)
    wph_t = jnp.pad(W_ph.astype(f32).T,
                    ((0, Hp - num_hidden), (0, Cp - num_classes))).astype(mxu_dtype)

    kernel = functools.partial(vanilla_rnn_kernel, mxu_dtype=mxu_dtype)

    y_pad = pl.pallas_call(
        kernel,
        out_shape=jax.ShapeDtypeStruct((Bp, Cp), jnp.float32),
        grid=(num_blocks,),
        in_specs=[
            pl.BlockSpec((B_blk, seq_length), lambda b: (b, 0)),   # x
            pl.BlockSpec((1, Hp), lambda b: (0, 0)),               # W_hx^T
            pl.BlockSpec((1, Hp), lambda b: (0, 0)),               # b_h^T
            pl.BlockSpec((1, Cp), lambda b: (0, 0)),               # b_p^T
            pl.BlockSpec(memory_space=pl.ANY),                     # W_hh^T (HBM)
            pl.BlockSpec(memory_space=pl.ANY),                     # W_ph^T (HBM)
        ],
        out_specs=pl.BlockSpec((B_blk, Cp), lambda b: (b, 0)),
        scratch_shapes=[
            pltpu.VMEM((Hp, Hp), mxu_dtype),      # single-buffered W_hh^T
            pltpu.VMEM((Hp, Cp), mxu_dtype),      # single-buffered W_ph^T
            pltpu.SemaphoreType.DMA((2,)),
        ],
        compiler_params=pltpu.CompilerParams(
            dimension_semantics=("parallel",),
            vmem_limit_bytes=_pick_vmem_limit_bytes(),
        ),
    )(x_pad, whx_row, bh_row, bp_row, whh_t, wph_t)

    # Strip padding and return in the torch (num_classes, batch) convention.
    return y_pad[:batch, :num_classes].T


def reference_forward(x, W_hx, W_hh, W_ph, b_h, b_p):
    """Pure-JAX reference mirroring the PyTorch loop exactly (f32)."""
    batch, seq_length = x.shape
    H = W_hh.shape[0]
    h_prev = jnp.zeros((H, batch), jnp.float32)
    y_t = None
    for i in range(seq_length):
        x_t = x[:, i].reshape(1, batch)
        h_t = jnp.tanh(W_hx @ x_t + W_hh @ h_prev + b_h)
        y_t = W_ph @ h_t + b_p
        h_prev = h_t
    return y_t


if __name__ == "__main__":
    # Small shapes consistent with the module's forward (input_dim must be 1).
    seq_length = 8
    input_dim = 1
    num_hidden = 32
    num_classes = 10
    batch_size = 4

    key = jax.random.PRNGKey(0)
    k1, k2, k3, kx = jax.random.split(key, 4)

    # Deterministic parameter init matching Normal(0, 0.1) / ones from __init__.
    W_hx = (0.1 * jax.random.normal(k1, (num_hidden, input_dim))).astype(jnp.float32)
    W_hh = (0.1 * jax.random.normal(k2, (num_hidden, num_hidden))).astype(jnp.float32)
    W_ph = (0.1 * jax.random.normal(k3, (num_classes, num_hidden))).astype(jnp.float32)
    b_h = jnp.ones((num_hidden, 1), jnp.float32)
    b_p = jnp.ones((num_classes, 1), jnp.float32)

    x = jax.random.normal(kx, (batch_size, seq_length)).astype(jnp.float32)

    y_ref = reference_forward(x, W_hx, W_hh, W_ph, b_h, b_p)

    # f32 MXU path (default): must match the PyTorch/f32 reference tightly.
    y = vanilla_rnn_forward(x, W_hx, W_hh, W_ph, b_h, b_p)
    y = jax.block_until_ready(y)
    assert y.shape == (num_classes, batch_size)
    assert jnp.allclose(y, y_ref, atol=1e-5, rtol=1e-5), "f32 kernel mismatch vs reference"

    # bf16-operand MXU path (f32 accumulate / f32 tanh): small bounded drift.
    # NOTE: this bound is only validated at H=32, T=8; re-validate at larger
    # H/T since error compounds through the recurrence.
    y_bf16 = vanilla_rnn_forward(x, W_hx, W_hh, W_ph, b_h, b_p,
                                 mxu_dtype=jnp.bfloat16)
    y_bf16 = jax.block_until_ready(y_bf16)
    assert jnp.max(jnp.abs(y_bf16 - y_ref)) < 0.2, "bf16-MXU kernel drifted too far"

    # Explicit 2-way batch split path (what a v7x part would use by default).
    y_split = vanilla_rnn_forward(x, W_hx, W_hh, W_ph, b_h, b_p,
                                  num_batch_blocks=2)
    y_split = jax.block_until_ready(y_split)
    assert jnp.allclose(y_split, y_ref, atol=1e-5, rtol=1e-5), "split-grid kernel mismatch"

    print("KERNEL_OK")
</pallas_src>

<mosaic_0001>
module attributes {stable_mosaic.version = 11 : i64} {
  func.func @vanilla_rnn_kernel(%arg0: i32, %arg1: memref<8x8xf32, #tpu.memory_space<vmem>>, %arg2: memref<1x128xf32, #tpu.memory_space<vmem>>, %arg3: memref<1x128xf32, #tpu.memory_space<vmem>>, %arg4: memref<1x128xf32, #tpu.memory_space<vmem>>, %arg5: memref<128x128xf32, #tpu.memory_space<any>>, %arg6: memref<128x128xf32, #tpu.memory_space<any>>, %arg7: memref<8x128xf32, #tpu.memory_space<vmem>>, %arg8: memref<128x128xf32, #tpu.memory_space<vmem>>, %arg9: memref<128x128xf32, #tpu.memory_space<vmem>>, %arg10: memref<2x!tpu.dma_semaphore, #tpu.memory_space<semaphore_mem>>) attributes {dimension_semantics = [#tpu.dimension_semantics<parallel>], iteration_bounds = array<i64: 1>, scalar_prefetch = 0 : i64, scratch_operands = 3 : i64, tpu.core_type = #tpu.core_type<tc>, window_params = [{transform_indices = @transform_0, window_bounds = array<i64: 8, 8>}, {pipeline_mode = #tpu.pipeline_mode<synchronous>, transform_indices = @transform_1, window_bounds = array<i64: 1, 128>}, {pipeline_mode = #tpu.pipeline_mode<synchronous>, transform_indices = @transform_2, window_bounds = array<i64: 1, 128>}, {pipeline_mode = #tpu.pipeline_mode<synchronous>, transform_indices = @transform_3, window_bounds = array<i64: 1, 128>}, {}, {}, {transform_indices = @transform_6, window_bounds = array<i64: 8, 128>}]} {
    %c0_i32 = arith.constant 0 : i32
    %0 = tpu.memref_slice %arg10[%c0_i32] : memref<2x!tpu.dma_semaphore, #tpu.memory_space<semaphore_mem>> -> memref<1x!tpu.dma_semaphore, #tpu.memory_space<semaphore_mem>>
    %1 = tpu.memref_squeeze %0 : memref<1x!tpu.dma_semaphore, #tpu.memory_space<semaphore_mem>> -> memref<!tpu.dma_semaphore, #tpu.memory_space<semaphore_mem>>
    tpu.enqueue_dma source(%arg5 : memref<128x128xf32, #tpu.memory_space<any>>) target(%arg8 : memref<128x128xf32, #tpu.memory_space<vmem>>) target_semaphore(%1 : memref<!tpu.dma_semaphore, #tpu.memory_space<semaphore_mem>>)
    %c1_i32 = arith.constant 1 : i32
    %2 = tpu.memref_slice %arg10[%c1_i32] : memref<2x!tpu.dma_semaphore, #tpu.memory_space<semaphore_mem>> -> memref<1x!tpu.dma_semaphore, #tpu.memory_space<semaphore_mem>>
    %3 = tpu.memref_squeeze %2 : memref<1x!tpu.dma_semaphore, #tpu.memory_space<semaphore_mem>> -> memref<!tpu.dma_semaphore, #tpu.memory_space<semaphore_mem>>
    tpu.enqueue_dma source(%arg6 : memref<128x128xf32, #tpu.memory_space<any>>) target(%arg9 : memref<128x128xf32, #tpu.memory_space<vmem>>) target_semaphore(%3 : memref<!tpu.dma_semaphore, #tpu.memory_space<semaphore_mem>>)
    %c0 = arith.constant 0 : index
    %c0_0 = arith.constant 0 : index
    %4 = vector.load %arg2[%c0, %c0_0] : memref<1x128xf32, #tpu.memory_space<vmem>>, vector<1x128xf32>
    %c0_1 = arith.constant 0 : index
    %c0_2 = arith.constant 0 : index
    %5 = vector.load %arg3[%c0_1, %c0_2] : memref<1x128xf32, #tpu.memory_space<vmem>>, vector<1x128xf32>
    %c0_3 = arith.constant 0 : index
    %c0_4 = arith.constant 0 : index
    %6 = vector.load %arg1[%c0_3, %c0_4] : memref<8x8xf32, #tpu.memory_space<vmem>>, vector<8x1xf32>
    %7 = vector.broadcast %6 : vector<8x1xf32> to vector<8x128xf32>
    %8 = vector.broadcast %4 : vector<1x128xf32> to vector<8x128xf32>
    %9 = arith.mulf %7, %8 : vector<8x128xf32>
    %10 = vector.broadcast %5 : vector<1x128xf32> to vector<8x128xf32>
    %11 = arith.addf %9, %10 : vector<8x128xf32>
    %12 = math.tanh %11 : vector<8x128xf32>
    %c0_i32_5 = arith.constant 0 : i32
    %13 = tpu.memref_slice %arg10[%c0_i32_5] : memref<2x!tpu.dma_semaphore, #tpu.memory_space<semaphore_mem>> -> memref<1x!tpu.dma_semaphore, #tpu.memory_space<semaphore_mem>>
    %14 = tpu.memref_squeeze %13 : memref<1x!tpu.dma_semaphore, #tpu.memory_space<semaphore_mem>> -> memref<!tpu.dma_semaphore, #tpu.memory_space<semaphore_mem>>
    tpu.wait_dma2 semaphore(%14 : memref<!tpu.dma_semaphore, #tpu.memory_space<semaphore_mem>>) src(%arg5 : memref<128x128xf32, #tpu.memory_space<any>>) dst(%arg8 : memref<128x128xf32, #tpu.memory_space<vmem>>)
    %c0_6 = arith.constant 0 : index
    %c0_7 = arith.constant 0 : index
    %15 = vector.load %arg8[%c0_6, %c0_7] : memref<128x128xf32, #tpu.memory_space<vmem>>, vector<128x128xf32>
    %cst = arith.constant dense<0.000000e+00> : vector<8x128xf32>
    %16 = tpu.matmul %12, %15, %cst {dimension_numbers = #tpu.dot_dimension_numbers<[1], [0], [0], [1], [0, 0, 1, 1], [], []>} : vector<8x128xf32>, vector<128x128xf32>, vector<8x128xf32> -> vector<8x128xf32>
    %c0_8 = arith.constant 0 : index
    %c1 = arith.constant 1 : index
    %17 = vector.load %arg1[%c0_8, %c1] : memref<8x8xf32, #tpu.memory_space<vmem>>, vector<8x1xf32>
    %18 = vector.broadcast %17 : vector<8x1xf32> to vector<8x128xf32>
    %19 = vector.broadcast %4 : vector<1x128xf32> to vector<8x128xf32>
    %20 = arith.mulf %18, %19 : vector<8x128xf32>
    %21 = vector.broadcast %5 : vector<1x128xf32> to vector<8x128xf32>
    %22 = arith.addf %20, %21 : vector<8x128xf32>
    %23 = arith.addf %22, %16 : vector<8x128xf32>
    %24 = math.tanh %23 : vector<8x128xf32>
    %c0_9 = arith.constant 0 : index
    %c0_10 = arith.constant 0 : index
    %25 = vector.load %arg8[%c0_9, %c0_10] : memref<128x128xf32, #tpu.memory_space<vmem>>, vector<128x128xf32>
    %cst_11 = arith.constant dense<0.000000e+00> : vector<8x128xf32>
    %26 = tpu.matmul %24, %25, %cst_11 {dimension_numbers = #tpu.dot_dimension_numbers<[1], [0], [0], [1], [0, 0, 1, 1], [], []>} : vector<8x128xf32>, vector<128x128xf32>, vector<8x128xf32> -> vector<8x128xf32>
    %c0_12 = arith.constant 0 : index
    %c2 = arith.constant 2 : index
    %27 = vector.load %arg1[%c0_12, %c2] : memref<8x8xf32, #tpu.memory_space<vmem>>, vector<8x1xf32>
    %28 = vector.broadcast %27 : vector<8x1xf32> to vector<8x128xf32>
    %29 = vector.broadcast %4 : vector<1x128xf32> to vector<8x128xf32>
    %30 = arith.mulf %28, %29 : vector<8x128xf32>
    %31 = vector.broadcast %5 : vector<1x128xf32> to vector<8x128xf32>
    %32 = arith.addf %30, %31 : vector<8x128xf32>
    %33 = arith.addf %32, %26 : vector<8x128xf32>
    %34 = math.tanh %33 : vector<8x128xf32>
    %c0_13 = arith.constant 0 : index
    %c0_14 = arith.constant 0 : index
    %35 = vector.load %arg8[%c0_13, %c0_14] : memref<128x128xf32, #tpu.memory_space<vmem>>, vector<128x128xf32>
    %cst_15 = arith.constant dense<0.000000e+00> : vector<8x128xf32>
    %36 = tpu.matmul %34, %35, %cst_15 {dimension_numbers = #tpu.dot_dimension_numbers<[1], [0], [0], [1], [0, 0, 1, 1], [], []>} : vector<8x128xf32>, vector<128x128xf32>, vector<8x128xf32> -> vector<8x128xf32>
    %c0_16 = arith.constant 0 : index
    %c3 = arith.constant 3 : index
    %37 = vector.load %arg1[%c0_16, %c3] : memref<8x8xf32, #tpu.memory_space<vmem>>, vector<8x1xf32>
    %38 = vector.broadcast %37 : vector<8x1xf32> to vector<8x128xf32>
    %39 = vector.broadcast %4 : vector<1x128xf32> to vector<8x128xf32>
    %40 = arith.mulf %38, %39 : vector<8x128xf32>
    %41 = vector.broadcast %5 : vector<1x128xf32> to vector<8x128xf32>
    %42 = arith.addf %40, %41 : vector<8x128xf32>
    %43 = arith.addf %42, %36 : vector<8x128xf32>
    %44 = math.tanh %43 : vector<8x128xf32>
    %c0_17 = arith.constant 0 : index
    %c0_18 = arith.constant 0 : index
    %45 = vector.load %arg8[%c0_17, %c0_18] : memref<128x128xf32, #tpu.memory_space<vmem>>, vector<128x128xf32>
    %cst_19 = arith.constant dense<0.000000e+00> : vector<8x128xf32>
    %46 = tpu.matmul %44, %45, %cst_19 {dimension_numbers = #tpu.dot_dimension_numbers<[1], [0], [0], [1], [0, 0, 1, 1], [], []>} : vector<8x128xf32>, vector<128x128xf32>, vector<8x128xf32> -> vector<8x128xf32>
    %c0_20 = arith.constant 0 : index
    %c4 = arith.constant 4 : index
    %47 = vector.load %arg1[%c0_20, %c4] : memref<8x8xf32, #tpu.memory_space<vmem>>, vector<8x1xf32>
    %48 = vector.broadcast %47 : vector<8x1xf32> to vector<8x128xf32>
    %49 = vector.broadcast %4 : vector<1x128xf32> to vector<8x128xf32>
    %50 = arith.mulf %48, %49 : vector<8x128xf32>
    %51 = vector.broadcast %5 : vector<1x128xf32> to vector<8x128xf32>
    %52 = arith.addf %50, %51 : vector<8x128xf32>
    %53 = arith.addf %52, %46 : vector<8x128xf32>
    %54 = math.tanh %53 : vector<8x128xf32>
    %c0_21 = arith.constant 0 : index
    %c0_22 = arith.constant 0 : index
    %55 = vector.load %arg8[%c0_21, %c0_22] : memref<128x128xf32, #tpu.memory_space<vmem>>, vector<128x128xf32>
    %cst_23 = arith.constant dense<0.000000e+00> : vector<8x128xf32>
    %56 = tpu.matmul %54, %55, %cst_23 {dimension_numbers = #tpu.dot_dimension_numbers<[1], [0], [0], [1], [0, 0, 1, 1], [], []>} : vector<8x128xf32>, vector<128x128xf32>, vector<8x128xf32> -> vector<8x128xf32>
    %c0_24 = arith.constant 0 : index
    %c5 = arith.constant 5 : index
    %57 = vector.load %arg1[%c0_24, %c5] : memref<8x8xf32, #tpu.memory_space<vmem>>, vector<8x1xf32>
    %58 = vector.broadcast %57 : vector<8x1xf32> to vector<8x128xf32>
    %59 = vector.broadcast %4 : vector<1x128xf32> to vector<8x128xf32>
    %60 = arith.mulf %58, %59 : vector<8x128xf32>
    %61 = vector.broadcast %5 : vector<1x128xf32> to vector<8x128xf32>
    %62 = arith.addf %60, %61 : vector<8x128xf32>
    %63 = arith.addf %62, %56 : vector<8x128xf32>
    %64 = math.tanh %63 : vector<8x128xf32>
    %c0_25 = arith.constant 0 : index
    %c0_26 = arith.constant 0 : index
    %65 = vector.load %arg8[%c0_25, %c0_26] : memref<128x128xf32, #tpu.memory_space<vmem>>, vector<128x128xf32>
    %cst_27 = arith.constant dense<0.000000e+00> : vector<8x128xf32>
    %66 = tpu.matmul %64, %65, %cst_27 {dimension_numbers = #tpu.dot_dimension_numbers<[1], [0], [0], [1], [0, 0, 1, 1], [], []>} : vector<8x128xf32>, vector<128x128xf32>, vector<8x128xf32> -> vector<8x128xf32>
    %c0_28 = arith.constant 0 : index
    %c6 = arith.constant 6 : index
    %67 = vector.load %arg1[%c0_28, %c6] : memref<8x8xf32, #tpu.memory_space<vmem>>, vector<8x1xf32>
    %68 = vector.broadcast %67 : vector<8x1xf32> to vector<8x128xf32>
    %69 = vector.broadcast %4 : vector<1x128xf32> to vector<8x128xf32>
    %70 = arith.mulf %68, %69 : vector<8x128xf32>
    %71 = vector.broadcast %5 : vector<1x128xf32> to vector<8x128xf32>
    %72 = arith.addf %70, %71 : vector<8x128xf32>
    %73 = arith.addf %72, %66 : vector<8x128xf32>
    %74 = math.tanh %73 : vector<8x128xf32>
    %c0_29 = arith.constant 0 : index
    %c0_30 = arith.constant 0 : index
    %75 = vector.load %arg8[%c0_29, %c0_30] : memref<128x128xf32, #tpu.memory_space<vmem>>, vector<128x128xf32>
    %cst_31 = arith.constant dense<0.000000e+00> : vector<8x128xf32>
    %76 = tpu.matmul %74, %75, %cst_31 {dimension_numbers = #tpu.dot_dimension_numbers<[1], [0], [0], [1], [0, 0, 1, 1], [], []>} : vector<8x128xf32>, vector<128x128xf32>, vector<8x128xf32> -> vector<8x128xf32>
    %c0_32 = arith.constant 0 : index
    %c7 = arith.constant 7 : index
    %77 = vector.load %arg1[%c0_32, %c7] : memref<8x8xf32, #tpu.memory_space<vmem>>, vector<8x1xf32>
    %78 = vector.broadcast %77 : vector<8x1xf32> to vector<8x128xf32>
    %79 = vector.broadcast %4 : vector<1x128xf32> to vector<8x128xf32>
    %80 = arith.mulf %78, %79 : vector<8x128xf32>
    %81 = vector.broadcast %5 : vector<1x128xf32> to vector<8x128xf32>
    %82 = arith.addf %80, %81 : vector<8x128xf32>
    %83 = arith.addf %82, %76 : vector<8x128xf32>
    %84 = math.tanh %83 : vector<8x128xf32>
    %c1_i32_33 = arith.constant 1 : i32
    %85 = tpu.memref_slice %arg10[%c1_i32_33] : memref<2x!tpu.dma_semaphore, #tpu.memory_space<semaphore_mem>> -> memref<1x!tpu.dma_semaphore, #tpu.memory_space<semaphore_mem>>
    %86 = tpu.memref_squeeze %85 : memref<1x!tpu.dma_semaphore, #tpu.memory_space<semaphore_mem>> -> memref<!tpu.dma_semaphore, #tpu.memory_space<semaphore_mem>>
    tpu.wait_dma2 semaphore(%86 : memref<!tpu.dma_semaphore, #tpu.memory_space<semaphore_mem>>) src(%arg6 : memref<128x128xf32, #tpu.memory_space<any>>) dst(%arg9 : memref<128x128xf32, #tpu.memory_space<vmem>>)
    %c0_34 = arith.constant 0 : index
    %c0_35 = arith.constant 0 : index
    %87 = vector.load %arg9[%c0_34, %c0_35] : memref<128x128xf32, #tpu.memory_space<vmem>>, vector<128x128xf32>
    %cst_36 = arith.constant dense<0.000000e+00> : vector<8x128xf32>
    %88 = tpu.matmul %84, %87, %cst_36 {dimension_numbers = #tpu.dot_dimension_numbers<[1], [0], [0], [1], [0, 0, 1, 1], [], []>} : vector<8x128xf32>, vector<128x128xf32>, vector<8x128xf32> -> vector<8x128xf32>
    %c0_37 = arith.constant 0 : index
    %c0_38 = arith.constant 0 : index
    %89 = vector.load %arg4[%c0_37, %c0_38] : memref<1x128xf32, #tpu.memory_space<vmem>>, vector<1x128xf32>
    %90 = vector.broadcast %89 : vector<1x128xf32> to vector<8x128xf32>
    %91 = arith.addf %88, %90 : vector<8x128xf32>
    %c0_39 = arith.constant 0 : index
    %c0_40 = arith.constant 0 : index
    %92 = vector.load %arg7[%c0_39, %c0_40] : memref<8x128xf32, #tpu.memory_space<vmem>>, vector<8x128xf32>
    tpu.vector_store %arg7[%c0_39, %c0_40], %91 {strides = array<i32>} : memref<8x128xf32, #tpu.memory_space<vmem>>, vector<8x128xf32>,
    return
  }
  func.func @transform_0(%arg0: i32) -> (i32, i32) {
    %c0_i32 = arith.constant 0 : i32
    %c0_i32_0 = arith.constant 0 : i32
    return %arg0, %c0_i32 : i32, i32
  }
  func.func @transform_1(%arg0: i32) -> (i32, i32) {
    %c0_i32 = arith.constant 0 : i32
    %c0_i32_0 = arith.constant 0 : i32
    %c0_i32_1 = arith.constant 0 : i32
    return %c0_i32, %c0_i32_0 : i32, i32
  }
  func.func @transform_2(%arg0: i32) -> (i32, i32) {
    %c0_i32 = arith.constant 0 : i32
    %c0_i32_0 = arith.constant 0 : i32
    %c0_i32_1 = arith.constant 0 : i32
    return %c0_i32, %c0_i32_0 : i32, i32
  }
  func.func @transform_3(%arg0: i32) -> (i32, i32) {
    %c0_i32 = arith.constant 0 : i32
    %c0_i32_0 = arith.constant 0 : i32
    %c0_i32_1 = arith.constant 0 : i32
    return %c0_i32, %c0_i32_0 : i32, i32
  }
  func.func @transform_6(%arg0: i32) -> (i32, i32) {
    %c0_i32 = arith.constant 0 : i32
    %c0_i32_0 = arith.constant 0 : i32
    return %arg0, %c0_i32 : i32, i32
  }
}

</mosaic_0001>

<bundles_post_ra>
// kernel: tpu_custom_call.1
= control target key start
LH: loop header
LB: loop body
LE: loop exit
PB: predicated region body
PF: predicated region fallthrough
CT: control target
= control target key end

     0   :  { %11 = vsyncpa [#allocation6], 0  ;;  %s1949_s0 = inlined_call_operand.hbm [shape: f32[8,8], index: 0, kind: input, shape index: {}]   ;;  %s1950_s1 = inlined_call_operand.hbm [shape: f32[1,128], index: 1, kind: input, shape index: {}]   ;;  %s1951_s2 = inlined_call_operand.hbm [shape: f32[1,128], index: 2, kind: input, shape index: {}]   ;;  %s1952_s3 = inlined_call_operand.hbm [shape: f32[1,128], index: 3, kind: input, shape index: {}]   ;;  %s1953_s4 = inlined_call_operand.hbm [shape: f32[128,128], index: 4, kind: input, shape index: {}]   ;;  %s1954_s5 = inlined_call_operand.hbm [shape: f32[128,128], index: 5, kind: input, shape index: {}]   ;;  %s1955_s6 = inlined_call_operand.hbm [shape: f32[8,128], index: 6, kind: output, shape index: {}]  }
   0x1   :  { %12 = vsyncpa [#allocation9], 0 }
   0x2   :  { %13 = vsyncpa [#allocation12], 0 }
   0x3   :  { %14 = vsyncpa [#allocation7], 0  ;;  %s1628_s21 = smov [#allocation8]   ;;  %s1629_s23 = smov [#allocation5]  }
   0x4   :  { %s31_s22 = sshll.u32 %s1628_s21, 4  ;;  %s21_s24 = sshll.u32 %s1629_s23, 4  ;;  %s32_s22 = int_to_ptr.vmem [resolvable:$true] %s31_s22  ;;  %s22_s24 = int_to_ptr.vmem [resolvable:$true] %s21_s24 }
   0x5   :  { %s1462_s27 = scalar_lea.hbm %s1950_s1, 16 }
   0x6   :  { %p1463_p0 = scmp.ne.s32.totalorder %s1950_s1, %s1462_s27  ;;  %p1466_p1 = scmp.lt.u32.totalorder %s1462_s27, %s1950_s1 }
   0x8   :  { %p1468_p2 = pnand %p1466_p1, %p1463_p0 }
   0xa   :  { %1471 = shalt.err (!%p1468_p2)
}
   0xb   :  { %s1472_s8 = scalar_lea.vmem %s32_s22, 16  ;;  %s1476_s9 = scalar_lea.vmem %s32_s22, 32 }
   0xc   :  { %p1473_p3 = scmp.ne.s32.totalorder %s32_s22, %s1472_s8  ;;  %p1477_p4 = scmp.lt.s32.totalorder %s32_s22, %s32_s22 }
   0xd   :  { %p1478_p5 = scmp.lt.s32.totalorder %s1476_s9, %s1472_s8 }
   0xf   :  { %p1479_p6 = por %p1478_p5, %p1477_p4 }
  0x11   :  { %p1480_p7 = pnand %p1479_p6, %p1473_p3 }
  0x13   :  { %1483 = shalt.err (!%p1480_p7)
}
  0x14   :  { %34 = dma.hbm_to_vmem [thread:$0]  %s1950_s1, 16, %s32_s22, [#allocation9]  }
  0x15   :  { %s1484_s14 = scalar_lea.hbm %s1949_s0, 128 }
  0x16   :  { %p1485_p8 = scmp.ne.s32.totalorder %s1949_s0, %s1484_s14  ;;  %p1488_p9 = scmp.lt.u32.totalorder %s1484_s14, %s1949_s0 }
  0x18   :  { %p1490_p10 = pnand %p1488_p9, %p1485_p8 }
  0x1a   :  { %1493 = shalt.err (!%p1490_p10)
}
  0x1b   :  { %s1494_s19 = scalar_lea.vmem %s22_s24, 128  ;;  %p1499_p12 = scmp.lt.s32.totalorder %s22_s24, %s22_s24 }
  0x1c   :  { %p1495_p11 = scmp.ne.s32.totalorder %s22_s24, %s1494_s19  ;;  %p1500_p13 = scmp.lt.s32.totalorder %s1494_s19, %s1494_s19 }
  0x1e   :  { %p1501_p0 = por %p1500_p13, %p1499_p12 }
  0x20   :  { %p1502_p1 = pnand %p1501_p0, %p1495_p11 }
  0x22   :  { %1505 = shalt.err (!%p1502_p1)
}
  0x23   :  { %24 = dma.hbm_to_vmem [thread:$0]  %s1949_s0, 128, %s22_s24, [#allocation6]  }
  0x24   :  { %s1630_s21 = smov [#allocation10]   ;;  %s1631_s23 = smov [#allocation11]  }
  0x25   :  { %s41_s22 = sshll.u32 %s1630_s21, 4  ;;  %s51_s25 = sshll.u32 %s1631_s23, 4  ;;  %s42_s22 = int_to_ptr.vmem [resolvable:$true] %s41_s22  ;;  %s52_s25 = int_to_ptr.vmem [resolvable:$true] %s51_s25 }
  0x26   :  { %s1506_s28 = scalar_lea.hbm %s1951_s2, 16 }
  0x27   :  { %p1507_p2 = scmp.ne.s32.totalorder %s1951_s2, %s1506_s28  ;;  %p1510_p3 = scmp.lt.u32.totalorder %s1506_s28, %s1951_s2 }
  0x29   :  { %p1512_p4 = pnand %p1510_p3, %p1507_p2 }
  0x2b   :  { %1515 = shalt.err (!%p1512_p4)
}
  0x2c   :  { %s1516_s0 = scalar_lea.vmem %s42_s22, 16  ;;  %s1520_s24 = scalar_lea.vmem %s42_s22, 32 }
  0x2d   :  { %p1517_p5 = scmp.ne.s32.totalorder %s42_s22, %s1516_s0  ;;  %p1521_p6 = scmp.lt.s32.totalorder %s42_s22, %s42_s22 }
  0x2e   :  { %p1522_p7 = scmp.lt.s32.totalorder %s1520_s24, %s1516_s0 }
  0x30   :  { %p1523_p8 = por %p1522_p7, %p1521_p6 }
  0x32   :  { %p1524_p9 = pnand %p1523_p8, %p1517_p5 }
  0x34   :  { %1527 = shalt.err (!%p1524_p9)
}
  0x35   :  { %44 = dma.hbm_to_vmem [thread:$0]  %s1951_s2, 16, %s42_s22, [#allocation9]  }
  0x36   :  { %s1528_s13 = scalar_lea.hbm %s1952_s3, 16 }
  0x37   :  { %p1529_p10 = scmp.ne.s32.totalorder %s1952_s3, %s1528_s13  ;;  %p1532_p11 = scmp.lt.u32.totalorder %s1528_s13, %s1952_s3 }
  0x39   :  { %p1534_p12 = pnand %p1532_p11, %p1529_p10 }
  0x3b   :  { %1537 = shalt.err (!%p1534_p12)
}
  0x3c   :  { %s1538_s18 = scalar_lea.vmem %s52_s25, 16  ;;  %s1542_s19 = scalar_lea.vmem %s52_s25, 32 }
  0x3d   :  { %p1539_p13 = scmp.ne.s32.totalorder %s52_s25, %s1538_s18  ;;  %p1543_p0 = scmp.lt.s32.totalorder %s52_s25, %s52_s25 }
  0x3e   :  { %p1544_p1 = scmp.lt.s32.totalorder %s1542_s19, %s1538_s18 }
  0x40   :  { %p1545_p2 = por %p1544_p1, %p1543_p0 }
  0x42   :  { %p1546_p3 = pnand %p1545_p2, %p1539_p13 }
  0x44   :  { %1549 = shalt.err (!%p1546_p3)
}
  0x45   :  { %54 = dma.hbm_to_vmem [thread:$0]  %s1952_s3, 16, %s52_s25, [#allocation12]  }
  0x46   :  { %1616 = dma.done.wait [#allocation6], 128  }
  0x47   :  { %1617 = vsyncadd [#allocation6], 4294967168 }
  0x48   :  { %1618 = dma.done.wait [#allocation9], 32  }
  0x49   :  { %1619 = vsyncadd [#allocation9], 4294967264 }
  0x4a   :  { %1620 = dma.done.wait [#allocation12], 16  }
  0x4b   :  { %1621 = vsyncadd [#allocation12], 4294967280  ;;  %v1632_v0 = vmov 0   ;;  %v92_v1 = vld [vmem:[#allocation5] sm:$0xff]  ;;  %s1633_s20 = smov [#allocation2]   ;;  %s1634_s22 = smov [#allocation3]  }
  0x4c   :  { %1437 = vset.pattern.permute.xlu0 %v1632_v0  ;;  %s74_s21 = sshll.u32 %s1633_s20, 4  ;;  %s86_s23 = sshll.u32 %s1634_s22, 4  ;;  %s75_s21 = int_to_ptr.vmem [resolvable:$true] %s74_s21  ;;  %s87_s23 = int_to_ptr.vmem [resolvable:$true] %s86_s23 }
  0x4d   :  { %95 = vperm.xlu0 %1437, %v92_v1   ;;  %s1550_s28 = scalar_lea.hbm %s1953_s4, 2048 }
  0x4e   :  { %p1551_p4 = scmp.ne.s32.totalorder %s1953_s4, %s1550_s28  ;;  %p1554_p5 = scmp.lt.u32.totalorder %s1550_s28, %s1953_s4 }
  0x50   :  { %p1556_p6 = pnand %p1554_p5, %p1551_p4 }
  0x52   :  { %1559 = shalt.err (!%p1556_p6)  }
  0x53   :  { %s1560_s7 = scalar_lea.vmem %s75_s21, 2048  ;;  %p1565_p8 = scmp.lt.s32.totalorder %s75_s21, %s75_s21 }
  0x54   :  { %p1561_p7 = scmp.ne.s32.totalorder %s75_s21, %s1560_s7  ;;  %p1566_p9 = scmp.lt.s32.totalorder %s1560_s7, %s1560_s7 }
  0x56   :  { %p1567_p10 = por %p1566_p9, %p1565_p8 }
  0x58   :  { %p1568_p11 = pnand %p1567_p10, %p1561_p7 }
  0x5a   :  { %1571 = shalt.err (!%p1568_p11)  }
  0x5b   :  { %77 = dma.hbm_to_vmem [thread:$0]  %s1953_s4, 2048, %s75_s21, [#allocation4] }
  0x5c   :  { %s1572_s10 = scalar_lea.hbm %s1954_s5, 2048 }
  0x5d   :  { %p1573_p12 = scmp.ne.s32.totalorder %s1954_s5, %s1572_s10  ;;  %p1576_p13 = scmp.lt.u32.totalorder %s1572_s10, %s1954_s5 }
  0x5f   :  { %p1578_p0 = pnand %p1576_p13, %p1573_p12 }
  0x61   :  { %1581 = shalt.err (!%p1578_p0)  }
  0x62   :  { %s1582_s15 = scalar_lea.vmem %s87_s23, 2048  ;;  %p1587_p2 = scmp.lt.s32.totalorder %s87_s23, %s87_s23 }
  0x63   :  { %p1583_p1 = scmp.ne.s32.totalorder %s87_s23, %s1582_s15  ;;  %p1588_p3 = scmp.lt.s32.totalorder %s1582_s15, %s1582_s15 }
  0x65   :  { %p1589_p4 = por %p1588_p3, %p1587_p2 }
  0x67   :  { %p1590_p5 = pnand %p1589_p4, %p1583_p1 }
  0x69   :  { %1593 = shalt.err (!%p1590_p5)  }
  0x6a   :  { %89 = dma.hbm_to_vmem [thread:$0]  %s1954_s5, 2048, %s87_s23, [#allocation4 + $0x1]  ;;  %v1753_v2 = vld [vmem:[#allocation8] ss:$0 sm:$0xff]  ;;  %v1755_v4 = vld [vmem:[#allocation10] ss:$0 sm:$0xff] }
  0xcc   :  { %v96_v3 = vpop.permute.xlu0 %95 }
  0xcd   :  { %v104_v5 = vmul.f32 %v1753_v2, %v96_v3 }
  0xcf   :  { %v111_v6 = vadd.f32 %v1755_v4, %v104_v5 }
  0xd1   :  { %1438 = vtanh.f32 %v111_v6 }
  0xdb   :  { %v1759_v7 = vpop.eup %1438 }
  0xdc   :  { %1622 = dma.done.wait [#allocation4], 2048 }
  0xdd   :  { %1623 = vsyncadd [#allocation4], 4294965248  ;;  %v1635_v8 = vmov 0.0|0.0   ;;  %vm1636_vm0 = vmmov 0   ;;  %v1637_v9 = vmov 0.0   ;;  %v1638_v10 = vmov 1  }
  0xde   :  { %1227 = vmatprep.subr.bf16.mxu0 %v1635_v8  ;;  %979 = vmatprep.mubr.msk.f32.mxu0 %vm1636_vm0, %v1637_v9  ;;  %v116_v11 = vld [vmem:[#allocation2] sm:$0xff]  ;;  %v117_v12 = vld [vmem:[#allocation2 + $0x8] sm:$0xff]  ;;  %v118_v13 = vld [vmem:[#allocation2 + $0x10] sm:$0xff]  ;;  %v1639_v36 = vmov 2   ;;  %v1640_v44 = vmov 3   ;;  %v1641_v52 = vmov 4  }
  0xdf   :  { %1440 = vset.pattern.permute.xlu0 %v1638_v10  ;;  %1251 = vmatprep.subr.bf16.mxu1 %v1635_v8  ;;  %v1767_v14 = vpack.c.bf16 %v117_v12, %v116_v11  ;;  %v119_v15 = vld [vmem:[#allocation2 + $0x18] sm:$0xff]  ;;  %v120_v17 = vld [vmem:[#allocation2 + $0x20] sm:$0xff]  ;;  %v121_v18 = vld [vmem:[#allocation2 + $0x28] sm:$0xff]  ;;  %v1642_v60 = vmov 5   ;;  %v1643_v6 = vmov 6  }
  0xe0   :  { %1014 = vmatprep.mubr.msk.f32.mxu1 %vm1636_vm0, %v1637_v9  ;;  %v1770_v16 = vpack.c.bf16 %v119_v15, %v118_v13  ;;  %v1775_v19 = vld [vmem:[#allocation5] sm:$0xff]  ;;  %v1779_v20 = vpack.c.bf16 %v121_v18, %v120_v17  ;;  %v122_v21 = vld [vmem:[#allocation2 + $0x30] sm:$0xff]  ;;  %v123_v22 = vld [vmem:[#allocation2 + $0x38] sm:$0xff]  ;;  %1442 = vset.pattern.permute.xlu1 %v1640_v44 }
  0xe1   :  { %1229 = vmatpush3.bf16.msra.mxu0 %v1767_v14  ;;  %1253 = vmatpush3.bf16.msra.mxu1 %v1767_v14  ;;  %v1785_v23 = vpack.c.bf16 %v123_v22, %v122_v21  ;;  %v124_v24 = vld [vmem:[#allocation2 + $0x40] sm:$0xff]  ;;  %v125_v25 = vld [vmem:[#allocation2 + $0x48] sm:$0xff]  ;;  %v126_v27 = vld [vmem:[#allocation2 + $0x50] sm:$0xff] }
  0xe2   :  { %1230 = vmatprep.subr.bf16.mxu0 %v1635_v8  ;;  %1254 = vmatprep.subr.bf16.mxu1 %v1635_v8  ;;  %v1791_v26 = vpack.c.bf16 %v125_v25, %v124_v24  ;;  %v127_v28 = vld [vmem:[#allocation2 + $0x58] sm:$0xff]  ;;  %v128_v30 = vld [vmem:[#allocation2 + $0x60] sm:$0xff]  ;;  %v129_v31 = vld [vmem:[#allocation2 + $0x68] sm:$0xff] }
  0xe3   :  { %205 = vperm.xlu0 %1440, %v1775_v19   ;;  %v1797_v29 = vpack.c.bf16 %v127_v28, %v126_v27  ;;  %v1803_v32 = vpack.c.bf16 %v129_v31, %v128_v30  ;;  %v130_v33 = vld [vmem:[#allocation2 + $0x70] sm:$0xff]  ;;  %v131_v34 = vld [vmem:[#allocation2 + $0x78] sm:$0xff]  ;;  %361 = vperm.xlu1 %1442, %v1775_v19  }
  0xe4   :  { %v1809_v35 = vpack.c.bf16 %v131_v34, %v130_v33 }
  0xe5   :  { %1232 = vmatpush3.bf16.msra.mxu0 %v1770_v16  ;;  %1256 = vmatpush3.bf16.msra.mxu1 %v1770_v16 }
  0xe6   :  { %1233 = vmatprep.subr.bf16.mxu0 %v1635_v8  ;;  %1257 = vmatprep.subr.bf16.mxu1 %v1635_v8 }
  0xe7   :  { %1441 = vset.pattern.permute.xlu0 %v1639_v36  ;;  %1443 = vset.pattern.permute.xlu1 %v1641_v52 }
  0xe8   :  { %283 = vperm.xlu0 %1441, %v1775_v19   ;;  %439 = vperm.xlu1 %1443, %v1775_v19  }
  0xe9   :  { %1235 = vmatpush3.bf16.msra.mxu0 %v1779_v20  ;;  %1259 = vmatpush3.bf16.msra.mxu1 %v1779_v20 }
  0xea   :  { %1236 = vmatprep.subr.bf16.mxu0 %v1635_v8  ;;  %1260 = vmatprep.subr.bf16.mxu1 %v1635_v8 }
  0xec   :  { %1444 = vset.pattern.permute.xlu1 %v1642_v60  ;;  %1445 = vset.pattern.permute.xlu0 %v1643_v6 }
  0xed   :  { %1238 = vmatpush3.bf16.msra.mxu0 %v1785_v23  ;;  %1262 = vmatpush3.bf16.msra.mxu1 %v1785_v23 }
  0xee   :  { %1239 = vmatprep.subr.bf16.mxu0 %v1635_v8  ;;  %1263 = vmatprep.subr.bf16.mxu1 %v1635_v8 }
  0xef   :  { %517 = vperm.xlu1 %1444, %v1775_v19   ;;  %595 = vperm.xlu0 %1445, %v1775_v19  }
  0xf1   :  { %1241 = vmatpush3.bf16.msra.mxu0 %v1791_v26  ;;  %1265 = vmatpush3.bf16.msra.mxu1 %v1791_v26 }
  0xf2   :  { %1242 = vmatprep.subr.bf16.mxu0 %v1635_v8  ;;  %1266 = vmatprep.subr.bf16.mxu1 %v1635_v8 }
  0xf5   :  { %1244 = vmatpush3.bf16.msra.mxu0 %v1797_v29  ;;  %1268 = vmatpush3.bf16.msra.mxu1 %v1797_v29 }
  0xf6   :  { %1245 = vmatprep.subr.bf16.mxu0 %v1635_v8  ;;  %1269 = vmatprep.subr.bf16.mxu1 %v1635_v8 }
  0xf9   :  { %1247 = vmatpush3.bf16.msra.mxu0 %v1803_v32  ;;  %1271 = vmatpush3.bf16.msra.mxu1 %v1803_v32 }
  0xfa   :  { %1248 = vmatprep.subr.bf16.mxu0 %v1635_v8  ;;  %1272 = vmatprep.subr.bf16.mxu1 %v1635_v8 }
  0xfd   :  { %1250 = vmatpush3.bf16.msra.mxu0 %v1809_v35  ;;  %1274 = vmatpush3.bf16.msra.mxu1 %v1809_v35 }
  0xfe   :  { %1275 = vmatprep.subr.bf16.mxu0 %v1635_v8  ;;  %1299 = vmatprep.subr.bf16.mxu1 %v1635_v8 }
 0x100   :  { %980 = vmatmul.mubr.f32.vlgmr.msra.gmra.mrb[0].mxu0 %v1759_v7 }
 0x101   :  { %1277 = vmatpush3.bf16.msra.mxu0 %v1767_v14  ;;  %1049 = vmatprep.mubr.msk.f32.mxu0 %vm1636_vm0, %v1637_v9 }
 0x102   :  { %1278 = vmatprep.subr.bf16.mxu0 %v1635_v8 }
 0x105   :  { %1280 = vmatpush3.bf16.msra.mxu0 %v1770_v16 }
 0x106   :  { %1281 = vmatprep.subr.bf16.mxu0 %v1635_v8 }
 0x109   :  { %1283 = vmatpush3.bf16.msra.mxu0 %v1779_v20 }
 0x10a   :  { %1284 = vmatprep.subr.bf16.mxu0 %v1635_v8 }
 0x10d   :  { %1286 = vmatpush3.bf16.msra.mxu0 %v1785_v23 }
 0x10e   :  { %1287 = vmatprep.subr.bf16.mxu0 %v1635_v8 }
 0x111   :  { %1289 = vmatpush3.bf16.msra.mxu0 %v1791_v26 }
 0x112   :  { %1290 = vmatprep.subr.bf16.mxu0 %v1635_v8 }
 0x115   :  { %1292 = vmatpush3.bf16.msra.mxu0 %v1797_v29 }
 0x116   :  { %1293 = vmatprep.subr.bf16.mxu0 %v1635_v8 }
 0x119   :  { %1295 = vmatpush3.bf16.msra.mxu0 %v1803_v32 }
 0x11a   :  { %1296 = vmatprep.subr.bf16.mxu0 %v1635_v8 }
 0x11d   :  { %1298 = vmatpush3.bf16.msra.mxu0 %v1809_v35 }
 0x11e   :  { %1323 = vmatprep.subr.bf16.mxu0 %v1635_v8 }
 0x162   :  { %v206_v37 = vpop.permute.xlu0 %205  ;;  %v362_v53 = vpop.permute.xlu1 %361 }
 0x163   :  { %v208_v38 = vmul.f32 %v1753_v2, %v206_v37  ;;  %v364_v54 = vmul.f32 %v1753_v2, %v362_v53 }
 0x165   :  { %v209_v39 = vadd.f32 %v1755_v4, %v208_v38  ;;  %v365_v55 = vadd.f32 %v1755_v4, %v364_v54 }
 0x167   :  { %v284_v45 = vpop.permute.xlu0 %283  ;;  %v440_v61 = vpop.permute.xlu1 %439 }
 0x168   :  { %v286_v46 = vmul.f32 %v1753_v2, %v284_v45  ;;  %v442_v62 = vmul.f32 %v1753_v2, %v440_v61 }
 0x16a   :  { %v287_v47 = vadd.f32 %v1755_v4, %v286_v46  ;;  %v443_v63 = vadd.f32 %v1755_v4, %v442_v62 }
 0x16e   :  { %v518_v7 = vpop.permute.xlu1 %517  ;;  %v596_v17 = vpop.permute.xlu0 %595 }
 0x16f   :  { %v520_v10 = vmul.f32 %v1753_v2, %v518_v7  ;;  %v598_v18 = vmul.f32 %v1753_v2, %v596_v17 }
 0x171   :  { %v521_v11 = vadd.f32 %v1755_v4, %v520_v10 }
 0x1d3   :  { %v198_v40 = vpop.f32.mrb[0].mxu0 }
 0x1d4   :  { %v210_v41 = vadd.f32 %v209_v39, %v198_v40  ;;  %v981_v42 = vpop.f32.mrb[1].mxu0 }
 0x1d6   :  { %1448 = vtanh.f32 %v210_v41 }
 0x1e0   :  { %v1449_v43 = vpop.eup %1448 }
 0x1e1   :  { %1015 = vmatmul.mubr.f32.vlgmr.msra.gmra.mrb[0].mxu1 %v1449_v43 }
 0x1e2   :  { %1301 = vmatpush3.bf16.msra.mxu1 %v1767_v14  ;;  %1084 = vmatprep.mubr.msk.f32.mxu1 %vm1636_vm0, %v1637_v9 }
 0x1e3   :  { %1302 = vmatprep.subr.bf16.mxu1 %v1635_v8 }
 0x1e6   :  { %1304 = vmatpush3.bf16.msra.mxu1 %v1770_v16 }
 0x1e7   :  { %1305 = vmatprep.subr.bf16.mxu1 %v1635_v8 }
 0x1ea   :  { %1307 = vmatpush3.bf16.msra.mxu1 %v1779_v20 }
 0x1eb   :  { %1308 = vmatprep.subr.bf16.mxu1 %v1635_v8 }
 0x1ee   :  { %1310 = vmatpush3.bf16.msra.mxu1 %v1785_v23 }
 0x1ef   :  { %1311 = vmatprep.subr.bf16.mxu1 %v1635_v8 }
 0x1f2   :  { %1313 = vmatpush3.bf16.msra.mxu1 %v1791_v26 }
 0x1f3   :  { %1314 = vmatprep.subr.bf16.mxu1 %v1635_v8 }
 0x1f6   :  { %1316 = vmatpush3.bf16.msra.mxu1 %v1797_v29 }
 0x1f7   :  { %1317 = vmatprep.subr.bf16.mxu1 %v1635_v8 }
 0x1fa   :  { %1319 = vmatpush3.bf16.msra.mxu1 %v1803_v32 }
 0x1fb   :  { %1320 = vmatprep.subr.bf16.mxu1 %v1635_v8 }
 0x1fe   :  { %1322 = vmatpush3.bf16.msra.mxu1 %v1809_v35 }
 0x1ff   :  { %1347 = vmatprep.subr.bf16.mxu1 %v1635_v8 }
 0x2b4   :  { %v278_v48 = vpop.f32.mrb[0].mxu1 }
 0x2b5   :  { %v288_v49 = vadd.f32 %v287_v47, %v278_v48  ;;  %v1016_v50 = vpop.f32.mrb[1].mxu1 }
 0x2b7   :  { %1450 = vtanh.f32 %v288_v49 }
 0x2c1   :  { %v1451_v51 = vpop.eup %1450 }
 0x2c2   :  { %1050 = vmatmul.mubr.f32.vlgmr.msra.gmra.mrb[2].mxu0 %v1451_v51 }
 0x2c3   :  { %1325 = vmatpush3.bf16.msra.mxu0 %v1767_v14  ;;  %1119 = vmatprep.mubr.msk.f32.mxu0 %vm1636_vm0, %v1637_v9 }
 0x2c4   :  { %1326 = vmatprep.subr.bf16.mxu0 %v1635_v8 }
 0x2c7   :  { %1328 = vmatpush3.bf16.msra.mxu0 %v1770_v16 }
 0x2c8   :  { %1329 = vmatprep.subr.bf16.mxu0 %v1635_v8 }
 0x2cb   :  { %1331 = vmatpush3.bf16.msra.mxu0 %v1779_v20 }
 0x2cc   :  { %1332 = vmatprep.subr.bf16.mxu0 %v1635_v8 }
 0x2cf   :  { %1334 = vmatpush3.bf16.msra.mxu0 %v1785_v23 }
 0x2d0   :  { %1335 = vmatprep.subr.bf16.mxu0 %v1635_v8 }
 0x2d3   :  { %1337 = vmatpush3.bf16.msra.mxu0 %v1791_v26 }
 0x2d4   :  { %1338 = vmatprep.subr.bf16.mxu0 %v1635_v8 }
 0x2d7   :  { %1340 = vmatpush3.bf16.msra.mxu0 %v1797_v29 }
 0x2d8   :  { %1341 = vmatprep.subr.bf16.mxu0 %v1635_v8 }
 0x2db   :  { %1343 = vmatpush3.bf16.msra.mxu0 %v1803_v32 }
 0x2dc   :  { %1344 = vmatprep.subr.bf16.mxu0 %v1635_v8 }
 0x2df   :  { %1346 = vmatpush3.bf16.msra.mxu0 %v1809_v35 }
 0x2e0   :  { %1371 = vmatprep.subr.bf16.mxu0 %v1635_v8 }
 0x395   :  { %v356_v56 = vpop.f32.mrb[2].mxu0 }
 0x396   :  { %v366_v57 = vadd.f32 %v365_v55, %v356_v56  ;;  %v1051_v58 = vpop.f32.mrb[3].mxu0 }
 0x398   :  { %1452 = vtanh.f32 %v366_v57 }
 0x3a2   :  { %v1453_v59 = vpop.eup %1452 }
 0x3a3   :  { %1085 = vmatmul.mubr.f32.vlgmr.msra.gmra.mrb[2].mxu1 %v1453_v59 }
 0x3a4   :  { %1349 = vmatpush3.bf16.msra.mxu1 %v1767_v14  ;;  %1154 = vmatprep.mubr.msk.f32.mxu1 %vm1636_vm0, %v1637_v9 }
 0x3a5   :  { %1350 = vmatprep.subr.bf16.mxu1 %v1635_v8 }
 0x3a8   :  { %1352 = vmatpush3.bf16.msra.mxu1 %v1770_v16 }
 0x3a9   :  { %1353 = vmatprep.subr.bf16.mxu1 %v1635_v8 }
 0x3ac   :  { %1355 = vmatpush3.bf16.msra.mxu1 %v1779_v20 }
 0x3ad   :  { %1356 = vmatprep.subr.bf16.mxu1 %v1635_v8 }
 0x3b0   :  { %1358 = vmatpush3.bf16.msra.mxu1 %v1785_v23 }
 0x3b1   :  { %1359 = vmatprep.subr.bf16.mxu1 %v1635_v8 }
 0x3b4   :  { %1361 = vmatpush3.bf16.msra.mxu1 %v1791_v26 }
 0x3b5   :  { %1362 = vmatprep.subr.bf16.mxu1 %v1635_v8 }
 0x3b8   :  { %1364 = vmatpush3.bf16.msra.mxu1 %v1797_v29 }
 0x3b9   :  { %1365 = vmatprep.subr.bf16.mxu1 %v1635_v8 }
 0x3bc   :  { %1367 = vmatpush3.bf16.msra.mxu1 %v1803_v32 }
 0x3bd   :  { %1368 = vmatprep.subr.bf16.mxu1 %v1635_v8 }
 0x3c0   :  { %1370 = vmatpush3.bf16.msra.mxu1 %v1809_v35 }
 0x476   :  { %v434_v0 = vpop.f32.mrb[2].mxu1 }
 0x477   :  { %v444_v1 = vadd.f32 %v443_v63, %v434_v0  ;;  %v1086_v3 = vpop.f32.mrb[3].mxu1 }
 0x479   :  { %1454 = vtanh.f32 %v444_v1 }
 0x483   :  { %v1455_v5 = vpop.eup %1454 }
 0x484   :  { %1120 = vmatmul.mubr.f32.vlgmr.msra.gmra.mrb[4].mxu0 %v1455_v5 }
 0x485   :  { %1373 = vmatpush3.bf16.msra.mxu0 %v1767_v14  ;;  %1189 = vmatprep.mubr.msk.f32.mxu0 %vm1636_vm0, %v1637_v9 }
 0x486   :  { %1374 = vmatprep.subr.bf16.mxu0 %v1635_v8 }
 0x489   :  { %1376 = vmatpush3.bf16.msra.mxu0 %v1770_v16  ;;  %v1644_v16 = vmov 7  }
 0x48a   :  { %1377 = vmatprep.subr.bf16.mxu0 %v1635_v8  ;;  %1446 = vset.pattern.permute.xlu1 %v1644_v16 }
 0x48b   :  { %1447 = vset.pattern.permute.xlu0 %v1644_v16  ;;  %673 = vperm.xlu1 %1446, %v1775_v19  }
 0x48d   :  { %1379 = vmatpush3.bf16.msra.mxu0 %v1779_v20  ;;  %v599_v20 = vadd.f32 %v1755_v4, %v598_v18 }
 0x48e   :  { %1380 = vmatprep.subr.bf16.mxu0 %v1635_v8 }
 0x491   :  { %1382 = vmatpush3.bf16.msra.mxu0 %v1785_v23 }
 0x492   :  { %1383 = vmatprep.subr.bf16.mxu0 %v1635_v8 }
 0x495   :  { %1385 = vmatpush3.bf16.msra.mxu0 %v1791_v26 }
 0x496   :  { %1386 = vmatprep.subr.bf16.mxu0 %v1635_v8 }
 0x499   :  { %1388 = vmatpush3.bf16.msra.mxu0 %v1797_v29 }
 0x49a   :  { %1389 = vmatprep.subr.bf16.mxu0 %v1635_v8 }
 0x49d   :  { %1391 = vmatpush3.bf16.msra.mxu0 %v1803_v32 }
 0x49e   :  { %1392 = vmatprep.subr.bf16.mxu0 %v1635_v8 }
 0x4a1   :  { %1394 = vmatpush3.bf16.msra.mxu0 %v1809_v35 }
 0x50a   :  { %v674_v25 = vpop.permute.xlu1 %673 }
 0x50b   :  { %v676_v26 = vmul.f32 %v1753_v2, %v674_v25 }
 0x50d   :  { %v677_v27 = vadd.f32 %v1755_v4, %v676_v26 }
 0x557   :  { %v512_v12 = vpop.f32.mrb[4].mxu0 }
 0x558   :  { %v522_v13 = vadd.f32 %v521_v11, %v512_v12  ;;  %v1121_v14 = vpop.f32.mrb[5].mxu0 }
 0x55a   :  { %1456 = vtanh.f32 %v522_v13 }
 0x564   :  { %v1457_v15 = vpop.eup %1456 }
 0x565   :  { %1155 = vmatmul.mubr.f32.vlgmr.msra.gmra.mrb[4].mxu1 %v1457_v15 }
 0x638   :  { %v590_v21 = vpop.f32.mrb[4].mxu1 }
 0x639   :  { %v600_v22 = vadd.f32 %v599_v20, %v590_v21  ;;  %v1156_v23 = vpop.f32.mrb[5].mxu1 }
 0x63b   :  { %1458 = vtanh.f32 %v600_v22 }
 0x645   :  { %v1459_v24 = vpop.eup %1458 }
 0x646   :  { %1190 = vmatmul.mubr.f32.vlgmr.msra.gmra.mrb[6].mxu0 %v1459_v24 }
 0x719   :  { %v668_v28 = vpop.f32.mrb[6].mxu0 }
 0x71a   :  { %v678_v29 = vadd.f32 %v677_v27, %v668_v28  ;;  %v1191_v30 = vpop.f32.mrb[7].mxu0 }
 0x71c   :  { %1460 = vtanh.f32 %v678_v29 }
 0x726   :  { %v1461_v19 = vpop.eup %1460 }
 0x727   :  { %1624 = dma.done.wait [#allocation4 + $0x1], 2048 }
 0x728   :  { %1625 = vsyncadd [#allocation4 + $0x1], 4294965248  ;;  %1395 = vmatprep.subr.bf16.mxu1 %v1635_v8  ;;  %1224 = vmatprep.mubr.msk.f32.mxu1 %vm1636_vm0, %v1637_v9  ;;  %v682_v31 = vld [vmem:[#allocation3] sm:$0xff]  ;;  %v683_v32 = vld [vmem:[#allocation3 + $0x8] sm:$0xff]  ;;  %s1645_s5 = smov [#allocation13]  }
 0x729   :  { %v684_v33 = vld [vmem:[#allocation3 + $0x10] sm:$0xff]  ;;  %v1396_v34 = vpack.c.bf16 %v683_v32, %v682_v31  ;;  %v685_v35 = vld [vmem:[#allocation3 + $0x18] sm:$0xff]  ;;  %v686_v4 = vld [vmem:[#allocation3 + $0x20] sm:$0xff]  ;;  %s782_s17 = sshll.u32 %s1645_s5, 4  ;;  %s783_s17 = int_to_ptr.vmem [resolvable:$true] %s782_s17 }
 0x72a   :  { %v1399_v2 = vpack.c.bf16 %v685_v35, %v684_v33  ;;  %v687_v36 = vld [vmem:[#allocation3 + $0x28] sm:$0xff]  ;;  %v688_v38 = vld [vmem:[#allocation3 + $0x30] sm:$0xff]  ;;  %v689_v39 = vld [vmem:[#allocation3 + $0x38] sm:$0xff]  ;;  %s1594_s18 = scalar_lea.vmem %s783_s17, 128  ;;  %p1599_p7 = scmp.lt.s32.totalorder %s783_s17, %s783_s17 }
 0x72b   :  { %1397 = vmatpush3.bf16.msra.mxu1 %v1396_v34  ;;  %v1402_v37 = vpack.c.bf16 %v687_v36, %v686_v4  ;;  %v1405_v40 = vpack.c.bf16 %v689_v39, %v688_v38  ;;  %v690_v9 = vld [vmem:[#allocation3 + $0x40] sm:$0xff]  ;;  %v691_v41 = vld [vmem:[#allocation3 + $0x48] sm:$0xff]  ;;  %v692_v43 = vld [vmem:[#allocation3 + $0x50] sm:$0xff]  ;;  %p1595_p6 = scmp.ne.s32.totalorder %s783_s17, %s1594_s18  ;;  %p1600_p8 = scmp.lt.s32.totalorder %s1594_s18, %s1594_s18 }
 0x72c   :  { %1398 = vmatprep.subr.bf16.mxu1 %v1635_v8  ;;  %v1408_v42 = vpack.c.bf16 %v691_v41, %v690_v9  ;;  %v693_v44 = vld [vmem:[#allocation3 + $0x58] sm:$0xff]  ;;  %v694_v46 = vld [vmem:[#allocation3 + $0x60] sm:$0xff]  ;;  %v695_v47 = vld [vmem:[#allocation3 + $0x68] sm:$0xff] }
 0x72d   :  { %v1411_v45 = vpack.c.bf16 %v693_v44, %v692_v43  ;;  %v1414_v48 = vpack.c.bf16 %v695_v47, %v694_v46  ;;  %v696_v49 = vld [vmem:[#allocation3 + $0x70] sm:$0xff]  ;;  %v697_v50 = vld [vmem:[#allocation3 + $0x78] sm:$0xff]  ;;  %v808_v52 = vld [vmem:[#allocation11] ss:$0 sm:$0xff]  ;;  %p1601_p9 = por %p1600_p8, %p1599_p7 }
 0x72e   :  { %v1417_v51 = vpack.c.bf16 %v697_v50, %v696_v49 }
 0x72f   :  { %1400 = vmatpush3.bf16.msra.mxu1 %v1399_v2  ;;  %p1602_p10 = pnand %p1601_p9, %p1595_p6 }
 0x730   :  { %1401 = vmatprep.subr.bf16.mxu1 %v1635_v8 }
 0x733   :  { %1403 = vmatpush3.bf16.msra.mxu1 %v1402_v37 }
 0x734   :  { %1404 = vmatprep.subr.bf16.mxu1 %v1635_v8 }
 0x737   :  { %1406 = vmatpush3.bf16.msra.mxu1 %v1405_v40 }
 0x738   :  { %1407 = vmatprep.subr.bf16.mxu1 %v1635_v8 }
 0x73b   :  { %1409 = vmatpush3.bf16.msra.mxu1 %v1408_v42 }
 0x73c   :  { %1410 = vmatprep.subr.bf16.mxu1 %v1635_v8 }
 0x73f   :  { %1412 = vmatpush3.bf16.msra.mxu1 %v1411_v45 }
 0x740   :  { %1413 = vmatprep.subr.bf16.mxu1 %v1635_v8 }
 0x743   :  { %1415 = vmatpush3.bf16.msra.mxu1 %v1414_v48 }
 0x744   :  { %1416 = vmatprep.subr.bf16.mxu1 %v1635_v8 }
 0x747   :  { %1418 = vmatpush3.bf16.msra.mxu1 %v1417_v51 }
 0x74a   :  { %1225 = vmatmul.mubr.f32.vlgmr.msra.gmra.mrb[6].mxu1 %v1461_v19 }
 0x81d   :  { %v771_v53 = vpop.f32.mrb[6].mxu1 }
 0x81e   :  { %v772_v54 = vadd.f32 %v808_v52, %v771_v53  ;;  %v1226_v55 = vpop.f32.mrb[7].mxu1 }
 0x820   :  { %775 = vst [vmem:[#allocation13] sm:$0xff] %v772_v54 }
 0x821   :  { %1605 = shalt.err (!%p1602_p10)
}
 0x822   :  { %s1606_s1 = scalar_lea.hbm %s1955_s6, 128 }
 0x823   :  { %p1607_p11 = scmp.ne.s32.totalorder %s1955_s6, %s1606_s1  ;;  %p1610_p12 = scmp.lt.u32.totalorder %s1606_s1, %s1955_s6 }
 0x825   :  { %p1612_p13 = pnand %p1610_p12, %p1607_p11 }
 0x827   :  { %1615 = shalt.err (!%p1612_p13)
}
 0x828   :  { %785 = dma.vmem_to_hbm [thread:$0]  %s783_s17, 128, %s1955_s6, [#allocation7]  }
 0x829   :  { %1626 = dma.done.wait [#allocation7], 128  }
 0x82a   :  { %1627 = vsyncadd [#allocation7], 4294967168 }
 0x82b   :  { %789 = vsyncpa [#allocation6], 1 }
 0x82c   :  { %790 = vsyncpa [#allocation9], 1 }
 0x82d   :  { %791 = vsyncpa [#allocation12], 1 }
 0x82e   :  { %792 = vsyncpa [#allocation7], 1 }
 0x82f   :  { %793 = vsyncmov [#allocation4] }
 0x832   :  { %s794_s28 = vpop.sfrf %793 }
 0x833   :  { %p809_p0 = scmp.ne.s32.totalorder %s794_s28, 0 }
 0x835   :  { %798 = shalt.err (%p809_p0)  }
 0x836   :  { %800 = vsyncmov [#allocation4 + $0x1] }
 0x839   :  { %s801_s3 = vpop.sfrf %800 }
 0x83a   :  { %p810_p1 = scmp.ne.s32.totalorder %s801_s3, 0 }
 0x83c   :  { %805 = shalt.err (%p810_p1)  }

</bundles_post_ra>
